<compile_context>
chip_gen: v7x
topology: tpu7x:2x2x1
jax: 0.10.0
libtpu: 0.0.40
codegen_flags: <defaults>
</compile_context>

<pallas_src>
import jax
import jax.numpy as jnp
from jax.experimental import pallas as pl
from jax.experimental.pallas import tpu as pltpu

LANE = 128


def _round_up(x, m):
    return ((x + m - 1) // m) * m


def _critic_kernel(state_ref, action_ref,
                   w1s_ref, w1a_ref, b1_ref,
                   w2_ref, b2_ref,
                   w3_ref, b3_ref,
                   out_ref):
    # ---- layer 1: relu(concat([state, action]) @ W1 + b1) -------------------
    # concat is fused by splitting W1 into its state rows and action rows:
    #   concat([s, a]) @ W1 == s @ W1_s + a @ W1_a
    h1 = (jnp.dot(state_ref[...], w1s_ref[...], preferred_element_type=jnp.float32)
          + jnp.dot(action_ref[...], w1a_ref[...], preferred_element_type=jnp.float32)
          + b1_ref[...])
    h1 = jnp.maximum(h1, 0.0)

    # ---- layer 2: relu(h1 @ W2 + b2) ----------------------------------------
    h2 = jnp.maximum(
        jnp.dot(h1, w2_ref[...], preferred_element_type=jnp.float32) + b2_ref[...],
        0.0)

    # ---- layer 3: q = h2 @ W3 + b3  (output_size == 1) -----------------------
    # Computed as a VPU multiply + cross-lane sum (XLU) so the output block is a
    # single lane-narrow column instead of a 128-lane-padded matmul result.
    q = jnp.sum(h2 * w3_ref[...], axis=-1, keepdims=True) + b3_ref[...]
    out_ref[...] = q.astype(out_ref.dtype)


def critic_forward(state, action, params, *, tile_b=4096):
    """state: [B, state_dim], action: [B, action_dim] -> q: [B, 1]."""
    w1s, w1a, b1, w2, b2, w3, b3 = params
    B, state_dim = state.shape
    action_dim = action.shape[1]

    # Batch tile: as large as possible (per-grid-step overhead ~0.35 us) but
    # (a) a multiple of 8 (sublane rule for the block shape), (b) no larger than
    # the batch rounded up to 8, and (c) capped so the grid has >= 2 steps when
    # the batch allows it, so v7x can shard the "parallel" axis over both TCs.
    b_ceil = _round_up(B, 8)
    tile_b = max(8, (min(tile_b, b_ceil) // 8) * 8)
    if B >= 16 and tile_b > b_ceil // 2:
        tile_b = max(8, ((b_ceil // 2) // 8) * 8)
    grid = (pl.cdiv(B, tile_b),)   # ragged last block handled by Pallas

    # Weights / biases: constant block index -> VMEM-resident across all steps.
    resident = lambda a: pl.BlockSpec(a.shape, lambda i: (0, 0))

    out = pl.pallas_call(
        _critic_kernel,
        out_shape=jax.ShapeDtypeStruct((B, 1), jnp.float32),
        grid=grid,
        in_specs=[
            pl.BlockSpec((tile_b, state_dim), lambda i: (i, 0)),   # streamed
            pl.BlockSpec((tile_b, action_dim), lambda i: (i, 0)),  # streamed
            resident(w1s), resident(w1a), resident(b1),
            resident(w2), resident(b2),
            resident(w3), resident(b3),
        ],
        out_specs=pl.BlockSpec((tile_b, 1), lambda i: (i, 0)),
        compiler_params=pltpu.CompilerParams(
            dimension_semantics=("parallel",)),   # batch over TCs on v7x
    )(state, action, w1s, w1a, b1, w2, b2, w3, b3)

    return out


def init_params(key, input_size, hidden_size, output_size, state_dim):
    """PyTorch nn.Linear-like uniform init, stored permanently in the layout the
    kernel consumes: [in, out] weights, W1 split into state/action rows, hidden
    features zero-padded to the 128-lane width, W3 stored as a (1, h_pad) row
    vector, all in f32 (matches the PyTorch module's precision)."""
    # TODO(synk): output_size > 1 would need a padded matmul head; the DDPG
    # Critic emits a scalar Q-value, so only output_size == 1 is implemented.
    assert output_size == 1, "Critic head is a scalar Q-value"
    action_dim = input_size - state_dim
    h_pad = _round_up(hidden_size, LANE)

    ks = jax.random.split(key, 6)

    def lin(kw, kb, fan_in, fan_out):
        bound = 1.0 / (fan_in ** 0.5)
        w = jax.random.uniform(kw, (fan_in, fan_out), jnp.float32, -bound, bound)
        b = jax.random.uniform(kb, (1, fan_out), jnp.float32, -bound, bound)
        return w, b

    w1, b1 = lin(ks[0], ks[1], input_size, hidden_size)
    w2, b2 = lin(ks[2], ks[3], hidden_size, hidden_size)
    w3, b3 = lin(ks[4], ks[5], hidden_size, output_size)

    def pad2(a, rows, cols):
        return jnp.pad(a, ((0, rows - a.shape[0]), (0, cols - a.shape[1])))

    w1s = pad2(w1[:state_dim, :], state_dim, h_pad)      # (state_dim, h_pad)
    w1a = pad2(w1[state_dim:, :], action_dim, h_pad)     # (action_dim, h_pad)
    b1p = pad2(b1, 1, h_pad)                             # (1, h_pad)
    w2p = pad2(w2, h_pad, h_pad)                         # (h_pad, h_pad)
    b2p = pad2(b2, 1, h_pad)                             # (1, h_pad)
    w3p = pad2(w3.T, 1, h_pad)                           # (1, h_pad) row vector
    b3p = b3                                             # (1, 1)
    return (w1s, w1a, b1p, w2p, b2p, w3p, b3p)


def reference_forward(state, action, params):
    """Plain-JAX reference mirroring the PyTorch forward (explicit concat)."""
    w1s, w1a, b1, w2, b2, w3, b3 = params
    x = jnp.concatenate([state, action], axis=1)
    w1 = jnp.concatenate([w1s, w1a], axis=0)
    h1 = jnp.maximum(jnp.dot(x, w1, preferred_element_type=jnp.float32) + b1, 0.0)
    h2 = jnp.maximum(jnp.dot(h1, w2, preferred_element_type=jnp.float32) + b2, 0.0)
    q = jnp.dot(h2, w3.T, preferred_element_type=jnp.float32) + b3
    return q


if __name__ == "__main__":
    # Small shapes consistent with the Critic module.
    batch = 8
    state_dim, action_dim = 24, 8
    input_size = state_dim + action_dim     # 32
    hidden_size = 32
    output_size = 1

    key = jax.random.PRNGKey(0)
    k_s, k_a, k_p = jax.random.split(key, 3)
    state = jax.random.normal(k_s, (batch, state_dim), jnp.float32)
    action = jax.random.normal(k_a, (batch, action_dim), jnp.float32)
    params = init_params(k_p, input_size, hidden_size, output_size, state_dim)

    q = critic_forward(state, action, params)
    jax.block_until_ready(q)

    q_ref = reference_forward(state, action, params)
    assert q.shape == (batch, output_size)
    assert jnp.allclose(q, q_ref, atol=2e-2, rtol=2e-2), "mismatch vs reference"

    print("KERNEL_OK")
</pallas_src>

<mosaic_0001>
module attributes {stable_mosaic.version = 11 : i64} {
  func.func @_critic_kernel(%arg0: i32, %arg1: memref<8x24xf32, #tpu.memory_space<vmem>>, %arg2: memref<8x8xf32, #tpu.memory_space<vmem>>, %arg3: memref<24x128xf32, #tpu.memory_space<vmem>>, %arg4: memref<8x128xf32, #tpu.memory_space<vmem>>, %arg5: memref<1x128xf32, #tpu.memory_space<vmem>>, %arg6: memref<128x128xf32, #tpu.memory_space<vmem>>, %arg7: memref<1x128xf32, #tpu.memory_space<vmem>>, %arg8: memref<1x128xf32, #tpu.memory_space<vmem>>, %arg9: memref<1x1xf32, #tpu.memory_space<vmem>>, %arg10: memref<8x1xf32, #tpu.memory_space<vmem>>) attributes {dimension_semantics = [#tpu.dimension_semantics<parallel>], iteration_bounds = array<i64: 1>, scalar_prefetch = 0 : i64, scratch_operands = 0 : i64, tpu.core_type = #tpu.core_type<tc>, window_params = [{transform_indices = @transform_0, window_bounds = array<i64: 8, 24>}, {transform_indices = @transform_1, window_bounds = array<i64: 8, 8>}, {pipeline_mode = #tpu.pipeline_mode<synchronous>, transform_indices = @transform_2, window_bounds = array<i64: 24, 128>}, {pipeline_mode = #tpu.pipeline_mode<synchronous>, transform_indices = @transform_3, window_bounds = array<i64: 8, 128>}, {pipeline_mode = #tpu.pipeline_mode<synchronous>, transform_indices = @transform_4, window_bounds = array<i64: 1, 128>}, {pipeline_mode = #tpu.pipeline_mode<synchronous>, transform_indices = @transform_5, window_bounds = array<i64: 128, 128>}, {pipeline_mode = #tpu.pipeline_mode<synchronous>, transform_indices = @transform_6, window_bounds = array<i64: 1, 128>}, {pipeline_mode = #tpu.pipeline_mode<synchronous>, transform_indices = @transform_7, window_bounds = array<i64: 1, 128>}, {pipeline_mode = #tpu.pipeline_mode<synchronous>, transform_indices = @transform_8, window_bounds = array<i64: 1, 1>}, {transform_indices = @transform_9, window_bounds = array<i64: 8, 1>}]} {
    %c0 = arith.constant 0 : index
    %c0_0 = arith.constant 0 : index
    %0 = vector.load %arg1[%c0, %c0_0] : memref<8x24xf32, #tpu.memory_space<vmem>>, vector<8x24xf32>
    %c0_1 = arith.constant 0 : index
    %c0_2 = arith.constant 0 : index
    %1 = vector.load %arg3[%c0_1, %c0_2] : memref<24x128xf32, #tpu.memory_space<vmem>>, vector<24x128xf32>
    %cst = arith.constant dense<0.000000e+00> : vector<8x128xf32>
    %2 = tpu.matmul %0, %1, %cst {dimension_numbers = #tpu.dot_dimension_numbers<[1], [0], [0], [1], [0, 0, 1, 1], [], []>} : vector<8x24xf32>, vector<24x128xf32>, vector<8x128xf32> -> vector<8x128xf32>
    %c0_3 = arith.constant 0 : index
    %c0_4 = arith.constant 0 : index
    %3 = vector.load %arg2[%c0_3, %c0_4] : memref<8x8xf32, #tpu.memory_space<vmem>>, vector<8x8xf32>
    %c0_5 = arith.constant 0 : index
    %c0_6 = arith.constant 0 : index
    %4 = vector.load %arg4[%c0_5, %c0_6] : memref<8x128xf32, #tpu.memory_space<vmem>>, vector<8x128xf32>
    %cst_7 = arith.constant dense<0.000000e+00> : vector<8x128xf32>
    %5 = tpu.matmul %3, %4, %cst_7 {dimension_numbers = #tpu.dot_dimension_numbers<[1], [0], [0], [1], [0, 0, 1, 1], [], []>} : vector<8x8xf32>, vector<8x128xf32>, vector<8x128xf32> -> vector<8x128xf32>
    %6 = arith.addf %2, %5 : vector<8x128xf32>
    %c0_8 = arith.constant 0 : index
    %c0_9 = arith.constant 0 : index
    %7 = vector.load %arg5[%c0_8, %c0_9] : memref<1x128xf32, #tpu.memory_space<vmem>>, vector<1x128xf32>
    %8 = vector.broadcast %7 : vector<1x128xf32> to vector<8x128xf32>
    %9 = arith.addf %6, %8 : vector<8x128xf32>
    %cst_10 = arith.constant 0.000000e+00 : f32
    %10 = vector.broadcast %cst_10 : f32 to vector<8x128xf32>
    %11 = arith.maximumf %9, %10 : vector<8x128xf32>
    %c0_11 = arith.constant 0 : index
    %c0_12 = arith.constant 0 : index
    %12 = vector.load %arg6[%c0_11, %c0_12] : memref<128x128xf32, #tpu.memory_space<vmem>>, vector<128x128xf32>
    %cst_13 = arith.constant dense<0.000000e+00> : vector<8x128xf32>
    %13 = tpu.matmul %11, %12, %cst_13 {dimension_numbers = #tpu.dot_dimension_numbers<[1], [0], [0], [1], [0, 0, 1, 1], [], []>} : vector<8x128xf32>, vector<128x128xf32>, vector<8x128xf32> -> vector<8x128xf32>
    %c0_14 = arith.constant 0 : index
    %c0_15 = arith.constant 0 : index
    %14 = vector.load %arg7[%c0_14, %c0_15] : memref<1x128xf32, #tpu.memory_space<vmem>>, vector<1x128xf32>
    %15 = vector.broadcast %14 : vector<1x128xf32> to vector<8x128xf32>
    %16 = arith.addf %13, %15 : vector<8x128xf32>
    %cst_16 = arith.constant 0.000000e+00 : f32
    %17 = vector.broadcast %cst_16 : f32 to vector<8x128xf32>
    %18 = arith.maximumf %16, %17 : vector<8x128xf32>
    %c0_17 = arith.constant 0 : index
    %c0_18 = arith.constant 0 : index
    %19 = vector.load %arg8[%c0_17, %c0_18] : memref<1x128xf32, #tpu.memory_space<vmem>>, vector<1x128xf32>
    %20 = vector.broadcast %19 : vector<1x128xf32> to vector<8x128xf32>
    %21 = arith.mulf %18, %20 : vector<8x128xf32>
    %cst_19 = arith.constant dense<0.000000e+00> : vector<8xf32>
    %22 = vector.multi_reduction <add>, %21, %cst_19 [1] : vector<8x128xf32> to vector<8xf32>
    %23 = vector.shape_cast %22 : vector<8xf32> to vector<8x1xf32>
    %c0_20 = arith.constant 0 : index
    %c0_21 = arith.constant 0 : index
    %24 = vector.load %arg9[%c0_20, %c0_21] : memref<1x1xf32, #tpu.memory_space<vmem>>, vector<1x1xf32>
    %25 = vector.broadcast %24 : vector<1x1xf32> to vector<8x1xf32>
    %26 = arith.addf %23, %25 : vector<8x1xf32>
    %c0_22 = arith.constant 0 : index
    %c0_23 = arith.constant 0 : index
    %27 = vector.load %arg10[%c0_22, %c0_23] : memref<8x1xf32, #tpu.memory_space<vmem>>, vector<8x1xf32>
    tpu.vector_store %arg10[%c0_22, %c0_23], %26 {strides = array<i32>} : memref<8x1xf32, #tpu.memory_space<vmem>>, vector<8x1xf32>,
    return
  }
  func.func @transform_0(%arg0: i32) -> (i32, i32) {
    %c0_i32 = arith.constant 0 : i32
    %c0_i32_0 = arith.constant 0 : i32
    return %arg0, %c0_i32 : i32, i32
  }
  func.func @transform_1(%arg0: i32) -> (i32, i32) {
    %c0_i32 = arith.constant 0 : i32
    %c0_i32_0 = arith.constant 0 : i32
    return %arg0, %c0_i32 : i32, i32
  }
  func.func @transform_2(%arg0: i32) -> (i32, i32) {
    %c0_i32 = arith.constant 0 : i32
    %c0_i32_0 = arith.constant 0 : i32
    %c0_i32_1 = arith.constant 0 : i32
    return %c0_i32, %c0_i32_0 : i32, i32
  }
  func.func @transform_3(%arg0: i32) -> (i32, i32) {
    %c0_i32 = arith.constant 0 : i32
    %c0_i32_0 = arith.constant 0 : i32
    %c0_i32_1 = arith.constant 0 : i32
    return %c0_i32, %c0_i32_0 : i32, i32
  }
  func.func @transform_4(%arg0: i32) -> (i32, i32) {
    %c0_i32 = arith.constant 0 : i32
    %c0_i32_0 = arith.constant 0 : i32
    %c0_i32_1 = arith.constant 0 : i32
    return %c0_i32, %c0_i32_0 : i32, i32
  }
  func.func @transform_5(%arg0: i32) -> (i32, i32) {
    %c0_i32 = arith.constant 0 : i32
    %c0_i32_0 = arith.constant 0 : i32
    %c0_i32_1 = arith.constant 0 : i32
    return %c0_i32, %c0_i32_0 : i32, i32
  }
  func.func @transform_6(%arg0: i32) -> (i32, i32) {
    %c0_i32 = arith.constant 0 : i32
    %c0_i32_0 = arith.constant 0 : i32
    %c0_i32_1 = arith.constant 0 : i32
    return %c0_i32, %c0_i32_0 : i32, i32
  }
  func.func @transform_7(%arg0: i32) -> (i32, i32) {
    %c0_i32 = arith.constant 0 : i32
    %c0_i32_0 = arith.constant 0 : i32
    %c0_i32_1 = arith.constant 0 : i32
    return %c0_i32, %c0_i32_0 : i32, i32
  }
  func.func @transform_8(%arg0: i32) -> (i32, i32) {
    %c0_i32 = arith.constant 0 : i32
    %c0_i32_0 = arith.constant 0 : i32
    %c0_i32_1 = arith.constant 0 : i32
    return %c0_i32, %c0_i32_0 : i32, i32
  }
  func.func @transform_9(%arg0: i32) -> (i32, i32) {
    %c0_i32 = arith.constant 0 : i32
    %c0_i32_0 = arith.constant 0 : i32
    return %arg0, %c0_i32 : i32, i32
  }
}

</mosaic_0001>

<bundles_post_ra>
// kernel: tpu_custom_call.1
= control target key start
LH: loop header
LB: loop body
LE: loop exit
PB: predicated region body
PF: predicated region fallthrough
CT: control target
= control target key end

     0   :  { %s705_s0 = inlined_call_operand.hbm [shape: f32[8,24], index: 0, kind: input, shape index: {}]   ;;  %s706_s1 = inlined_call_operand.hbm [shape: f32[8,8], index: 1, kind: input, shape index: {}]   ;;  %s707_s2 = inlined_call_operand.hbm [shape: f32[24,128], index: 2, kind: input, shape index: {}]   ;;  %s708_s3 = inlined_call_operand.vmem [shape: f32[8,128], index: 3, kind: input, shape index: {}]   ;;  %s709_s4 = inlined_call_operand.vmem [shape: f32[1,128], index: 4, kind: input, shape index: {}]   ;;  %s710_s5 = inlined_call_operand.hbm [shape: f32[128,128], index: 5, kind: input, shape index: {}]   ;;  %s711_s6 = inlined_call_operand.vmem [shape: f32[1,128], index: 6, kind: input, shape index: {}]   ;;  %s712_s7 = inlined_call_operand.vmem [shape: f32[1,128], index: 7, kind: input, shape index: {}]   ;;  %s713_s8 = inlined_call_operand.<no memory space> [shape: f32[1,1], index: 8, kind: input, shape index: {}]   ;;  %s714_s9 = inlined_call_operand.vmem [shape: f32[8,1], index: 9, kind: output, shape index: {}]  }
   0x1   :  { %v14_v0 = vstv %s713_s8 }
   0x2   :  { %15 = vst [vmem:[#allocation2] sm:$0x1] %v14_v0 }
   0x3   :  { %16 = vsyncpa [#allocation4], 0 }
   0x4   :  { %17 = vsyncpa [#allocation6], 0 }
   0x5   :  { %18 = vsyncpa [#allocation9], 0  ;;  %s577_s11 = smov [#allocation5]   ;;  %s578_s13 = smov [#allocation3]  }
   0x6   :  { %s35_s12 = sshll.u32 %s577_s11, 4  ;;  %s25_s14 = sshll.u32 %s578_s13, 4  ;;  %s36_s12 = int_to_ptr.vmem [resolvable:$true] %s35_s12  ;;  %s26_s14 = int_to_ptr.vmem [resolvable:$true] %s25_s14 }
   0x7   :  { %s483_s17 = scalar_lea.hbm %s706_s1, 128 }
   0x8   :  { %p484_p0 = scmp.ne.s32.totalorder %s706_s1, %s483_s17  ;;  %p487_p1 = scmp.lt.u32.totalorder %s483_s17, %s706_s1 }
   0xa   :  { %p489_p2 = pnand %p487_p1, %p484_p0 }
   0xc   :  { %492 = shalt.err (!%p489_p2)
}
   0xd   :  { %s493_s21 = scalar_lea.vmem %s36_s12, 128  ;;  %p498_p4 = scmp.lt.s32.totalorder %s36_s12, %s36_s12 }
   0xe   :  { %p494_p3 = scmp.ne.s32.totalorder %s36_s12, %s493_s21  ;;  %p499_p5 = scmp.lt.s32.totalorder %s493_s21, %s493_s21 }
  0x10   :  { %p500_p6 = por %p499_p5, %p498_p4 }
  0x12   :  { %p501_p7 = pnand %p500_p6, %p494_p3 }
  0x14   :  { %504 = shalt.err (!%p501_p7)
}
  0x15   :  { %38 = dma.hbm_to_vmem [thread:$0]  %s706_s1, 128, %s36_s12, [#allocation6]  }
  0x16   :  { %s505_s26 = scalar_lea.hbm %s705_s0, 128 }
  0x17   :  { %p506_p8 = scmp.ne.s32.totalorder %s705_s0, %s505_s26  ;;  %p509_p9 = scmp.lt.u32.totalorder %s505_s26, %s705_s0 }
  0x19   :  { %p511_p10 = pnand %p509_p9, %p506_p8 }
  0x1b   :  { %514 = shalt.err (!%p511_p10)
}
  0x1c   :  { %s515_s10 = scalar_lea.vmem %s26_s14, 128  ;;  %p520_p12 = scmp.lt.s32.totalorder %s26_s14, %s26_s14 }
  0x1d   :  { %p516_p11 = scmp.ne.s32.totalorder %s26_s14, %s515_s10  ;;  %p521_p13 = scmp.lt.s32.totalorder %s515_s10, %s515_s10 }
  0x1f   :  { %p522_p0 = por %p521_p13, %p520_p12 }
  0x21   :  { %p523_p1 = pnand %p522_p0, %p516_p11 }
  0x23   :  { %526 = shalt.err (!%p523_p1)
}
  0x24   :  { %28 = dma.hbm_to_vmem [thread:$0]  %s705_s0, 128, %s26_s14, [#allocation4]  }
  0x25   :  { %s579_s12 = smov [#allocation7]   ;;  %s527_s17 = scalar_lea.hbm %s707_s2, 384 }
  0x26   :  { %s44_s13 = sshll.u32 %s579_s12, 4  ;;  %p528_p2 = scmp.ne.s32.totalorder %s707_s2, %s527_s17  ;;  %s45_s13 = int_to_ptr.vmem [resolvable:$true] %s44_s13 }
  0x27   :  { %p531_p3 = scmp.lt.u32.totalorder %s527_s17, %s707_s2 }
  0x29   :  { %p533_p4 = pnand %p531_p3, %p528_p2 }
  0x2b   :  { %536 = shalt.err (!%p533_p4)
}
  0x2c   :  { %s537_s21 = scalar_lea.vmem %s45_s13, 384  ;;  %p542_p6 = scmp.lt.s32.totalorder %s45_s13, %s45_s13 }
  0x2d   :  { %p538_p5 = scmp.ne.s32.totalorder %s45_s13, %s537_s21  ;;  %p543_p7 = scmp.lt.s32.totalorder %s537_s21, %s537_s21 }
  0x2f   :  { %p544_p8 = por %p543_p7, %p542_p6 }
  0x31   :  { %p545_p9 = pnand %p544_p8, %p538_p5 }
  0x33   :  { %548 = shalt.err (!%p545_p9)
}
  0x34   :  { %s580_s0 = smov 128   ;;  %s581_s14 = smov 8  }
  0x35   :  { %50 = dma.hbm_to_vmem [thread:$0]  %s707_s2, 384, %s45_s13, [#allocation6], %s580_s0, %s580_s0, %s581_s14  }
  0x36   :  { %s582_s24 = smov [#allocation8]   ;;  %s549_s28 = scalar_lea.hbm %s710_s5, 2048 }
  0x37   :  { %s60_s25 = sshll.u32 %s582_s24, 4  ;;  %p550_p10 = scmp.ne.s32.totalorder %s710_s5, %s549_s28  ;;  %s61_s25 = int_to_ptr.vmem [resolvable:$true] %s60_s25 }
  0x38   :  { %p553_p11 = scmp.lt.u32.totalorder %s549_s28, %s710_s5 }
  0x3a   :  { %p555_p12 = pnand %p553_p11, %p550_p10 }
  0x3c   :  { %558 = shalt.err (!%p555_p12)
}
  0x3d   :  { %s559_s11 = scalar_lea.vmem %s61_s25, 2048  ;;  %p564_p0 = scmp.lt.s32.totalorder %s61_s25, %s61_s25 }
  0x3e   :  { %p560_p13 = scmp.ne.s32.totalorder %s61_s25, %s559_s11  ;;  %p565_p1 = scmp.lt.s32.totalorder %s559_s11, %s559_s11 }
  0x40   :  { %p566_p2 = por %p565_p1, %p564_p0 }
  0x42   :  { %p567_p3 = pnand %p566_p2, %p560_p13 }
  0x44   :  { %570 = shalt.err (!%p567_p3)
}
  0x45   :  { %66 = dma.hbm_to_vmem [thread:$0]  %s710_s5, 2048, %s61_s25, [#allocation9], %s580_s0, %s580_s0, %s581_s14  }
  0x46   :  { %571 = dma.done.wait [#allocation4], 128  }
  0x47   :  { %572 = vsyncadd [#allocation4], 4294967168 }
  0x48   :  { %573 = dma.done.wait [#allocation6], 512  }
  0x49   :  { %574 = vsyncadd [#allocation6], 4294966784 }
  0x4a   :  { %575 = dma.done.wait [#allocation9], 2048  }
  0x4b   :  { %576 = vsyncadd [#allocation9], 4294965248  ;;  %v583_v1 = vmov 0.0   ;;  %vm584_vm0 = vmmov 0   ;;  %v585_v2 = vmov 0.0|0.0   ;;  %vm91_vm1 = vcmask 64512  }
  0x4c   :  { %398 = vmatprep.subr.mxu1 %v583_v1  ;;  %400 = vmatprep.mubr.msk.f32.mxu1 %vm584_vm0, %v583_v1  ;;  %v90_v3 = vld [vmem:[%s708_s3] sm:$0xff]  ;;  %v89_v4 = vld [vmem:[#allocation5] sm:$0xff]  ;;  %v86_v5 = vld [vmem:[#allocation7] sm:$0xff]  ;;  %vm165_vm2 = vcmask 195584   ;;  %vm360_vm3 = vcmask 7168  }
  0x4d   :  { %450 = vmatprep.subr.bf16.mxu0 %v585_v2  ;;  %444 = vmatprep.mubr.msk.f32.mxu0 %vm584_vm0, %v583_v1  ;;  %v87_v6 = vld [vmem:[#allocation7 + $0x8] sm:$0xff]  ;;  %v248_v8 = vld [vmem:[#allocation8] sm:$0xff]  ;;  %v249_v9 = vld [vmem:[#allocation8 + $0x8] sm:$0xff] }
  0x4e   :  { %399 = vmatpush3.msra.mxu1 %v90_v3  ;;  %v448_v7 = vpack.c.bf16 %v87_v6, %v86_v5  ;;  %v250_v10 = vld [vmem:[#allocation8 + $0x10] sm:$0xff]  ;;  %v451_v11 = vpack.c.bf16 %v249_v9, %v248_v8  ;;  %v251_v12 = vld [vmem:[#allocation8 + $0x18] sm:$0xff]  ;;  %v252_v16 = vld [vmem:[#allocation8 + $0x20] sm:$0xff] }
  0x4f   :  { %401 = vmatmul.mubr.msk.f32.vlgmr.msra.gmra.mrb[0].mxu1 %vm91_vm1, %v89_v4  ;;  %447 = vmatprep.subr.bf16.mxu1 %v585_v2  ;;  %v88_v13 = vld [vmem:[#allocation7 + $0x10] sm:$0xff]  ;;  %v454_v14 = vpack.c.bf16 %v251_v12, %v250_v10  ;;  %v253_v17 = vld [vmem:[#allocation8 + $0x28] sm:$0xff]  ;;  %v254_v19 = vld [vmem:[#allocation8 + $0x30] sm:$0xff] }
  0x50   :  { %409 = vmatprep.mubr.msk.f32.mxu1 %vm584_vm0, %v583_v1  ;;  %449 = vmatpush3.bf16.msra.mxu1 %v448_v7  ;;  %v85_v15 = vld [vmem:[#allocation3] sm:$0xff]  ;;  %v457_v18 = vpack.c.bf16 %v253_v17, %v252_v16  ;;  %v256_v22 = vld [vmem:[#allocation8 + $0x40] sm:$0xff]  ;;  %v257_v23 = vld [vmem:[#allocation8 + $0x48] sm:$0xff] }
  0x51   :  { %407 = vmatprep.subr.mxu1 %v583_v1  ;;  %452 = vmatpush3.bf16.msra.mxu0 %v451_v11  ;;  %v255_v20 = vld [vmem:[#allocation8 + $0x38] sm:$0xff]  ;;  %v463_v24 = vpack.c.bf16 %v257_v23, %v256_v22  ;;  %v258_v25 = vld [vmem:[#allocation8 + $0x50] sm:$0xff]  ;;  %v260_v28 = vld [vmem:[#allocation8 + $0x60] sm:$0xff] }
  0x52   :  { %453 = vmatprep.subr.bf16.mxu0 %v585_v2  ;;  %v460_v21 = vpack.c.bf16 %v255_v20, %v254_v19  ;;  %v259_v26 = vld [vmem:[#allocation8 + $0x58] sm:$0xff]  ;;  %v261_v29 = vld [vmem:[#allocation8 + $0x68] sm:$0xff]  ;;  %v262_v31 = vld [vmem:[#allocation8 + $0x70] sm:$0xff] }
  0x53   :  { %v466_v27 = vpack.c.bf16 %v259_v26, %v258_v25  ;;  %v469_v30 = vpack.c.bf16 %v261_v29, %v260_v28  ;;  %v263_v32 = vld [vmem:[#allocation8 + $0x78] sm:$0xff]  ;;  %v371_v37 = vld [vmem:[%s709_s4] ss:$0 sm:$0xff] }
  0x54   :  { %408 = vmatpush3.msra.mxu1 %v88_v13  ;;  %v472_v33 = vpack.c.bf16 %v263_v32, %v262_v31  ;;  %v372_v42 = vld [vmem:[%s711_s6] ss:$0 sm:$0xff] }
  0x55   :  { %410 = vmatmul.mubr.msk.f32.vlgmr.msra.gmra.mrb[2].mxu1 %vm165_vm2, %v85_v15  ;;  %455 = vmatpush3.bf16.msra.mxu0 %v454_v14  ;;  %v373_v46 = vld [vmem:[%s712_s7] ss:$0 sm:$0xff] }
  0x56   :  { %456 = vmatprep.subr.bf16.mxu0 %v585_v2  ;;  %v374_v49 = vld [vmem:[#allocation2] ss:$0 sm:$0xff] }
  0x59   :  { %458 = vmatpush3.bf16.msra.mxu0 %v457_v18 }
  0x5a   :  { %459 = vmatprep.subr.bf16.mxu0 %v585_v2 }
  0x5d   :  { %461 = vmatpush3.bf16.msra.mxu0 %v460_v21 }
  0x5e   :  { %462 = vmatprep.subr.bf16.mxu0 %v585_v2 }
  0x61   :  { %464 = vmatpush3.bf16.msra.mxu0 %v463_v24 }
  0x62   :  { %465 = vmatprep.subr.bf16.mxu0 %v585_v2 }
  0x65   :  { %467 = vmatpush3.bf16.msra.mxu0 %v466_v27 }
  0x66   :  { %468 = vmatprep.subr.bf16.mxu0 %v585_v2 }
  0x69   :  { %470 = vmatpush3.bf16.msra.mxu0 %v469_v30 }
  0x6a   :  { %471 = vmatprep.subr.bf16.mxu0 %v585_v2 }
  0x6d   :  { %473 = vmatpush3.bf16.msra.mxu0 %v472_v33 }
 0x122   :  { %v161_v34 = vpop.f32.mrb[0].mxu1 }
 0x123   :  { %v402_v35 = vpop.f32.mrb[1].mxu1 }
 0x128   :  { %v235_v36 = vpop.f32.mrb[2].mxu1 }
 0x129   :  { %v236_v38 = vadd.f32 %v235_v36, %v161_v34  ;;  %v411_v39 = vpop.f32.mrb[3].mxu1 }
 0x12b   :  { %v246_v40 = vadd.f32 %v371_v37, %v236_v38 }
 0x12d   :  { %v247_v41 = vmax.f32 %v246_v40, 0.0 }
 0x12f   :  { %445 = vmatmul.mubr.f32.vlgmr.msra.gmra.mrb[0].mxu0 %v247_v41 }
 0x202   :  { %v337_v43 = vpop.f32.mrb[0].mxu0 }
 0x203   :  { %v338_v44 = vadd.f32 %v372_v42, %v337_v43  ;;  %v446_v45 = vpop.f32.mrb[1].mxu0 }
 0x205   :  { %v341_v47 = vmax.f32 %v338_v44, 0.0 }
 0x207   :  { %v349_v48 = vmul.f32 %v373_v46, %v341_v47 }
 0x209   :  { %350 = vadd.xlane.f32.xlu0 %v349_v48 }
 0x296   :  { %v351_v50 = vpop.xlane.xlu0 %350 }
 0x297   :  { %v359_v51 = vadd.f32 %v374_v49, %v351_v50 }
 0x299   :  { %361 = vst.msk [vmem:[%s714_s9] sm:$0xff] %vm360_vm3, %v359_v51 }
 0x29a   :  { %366 = vsyncpa [#allocation4], 1 }
 0x29b   :  { %367 = vsyncpa [#allocation6], 1 }
 0x29c   :  { %368 = vsyncpa [#allocation9], 1 }

</bundles_post_ra>
